<compile_context>
chip_gen: v7x
topology: tpu7x:2x2x1
jax: 0.10.0
libtpu: 0.0.40
codegen_flags: <defaults>
</compile_context>

<pallas_src>
import functools

import jax
import jax.numpy as jnp
from jax.experimental import pallas as pl
from jax.experimental.pallas import tpu as pltpu


def sccl_forward_kernel(x_ref, w1_ref, b1_ref, w2_ref, b2_ref, w3_ref, b3_ref, o_ref):
    """Fused 3-layer MLP head: relu(xW1+b1) -> relu(.W2+b2) -> .W3+b3 (logits)."""
    # x arrives in f32; cast to the weight (compute) dtype in-kernel so no
    # separate XLA cast pass over HBM is needed.
    x = x_ref[...].astype(w1_ref.dtype)

    # adapt: Linear -> ReLU   (Dropout is identity in eval mode)
    h1 = jnp.dot(x, w1_ref[...], preferred_element_type=jnp.float32) + b1_ref[...]
    h1 = jnp.maximum(h1, 0.0).astype(w2_ref.dtype)

    # adapt: Linear -> ReLU
    h2 = jnp.dot(h1, w2_ref[...], preferred_element_type=jnp.float32) + b2_ref[...]
    h2 = jnp.maximum(h2, 0.0).astype(w3_ref.dtype)

    # prob: Linear (logits, no activation)
    y = jnp.dot(h2, w3_ref[...], preferred_element_type=jnp.float32) + b3_ref[...]

    o_ref[...] = y.astype(o_ref.dtype)


def _round_up(x, m):
    return pl.cdiv(x, m) * m


def _vmem_limit_bytes(tile_b, e, c_pad, compute_dtype, out_dtype, weight_bufs):
    """Rough VMEM footprint: weights/biases (weight_bufs deep) + double-buffered IO."""
    wsz = jnp.dtype(compute_dtype).itemsize
    osz = jnp.dtype(out_dtype).itemsize
    weights = (2 * e * e + e * c_pad) * wsz + (2 * e + c_pad) * 4
    io = tile_b * e * 4 + tile_b * c_pad * osz          # f32 x in, out_dtype logits out
    est = weight_bufs * weights + 2 * io + (4 << 20)    # + headroom
    # Never drop below the 32 MiB scoped default (<= physical on all generations).
    return int(max(est, 32 << 20))


def prepare_params(params, *, compute_dtype=jnp.bfloat16):
    """One-time parameter prep (hoisted out of the per-call path).

    Casts weights to the compute dtype and lane-pads the class dimension of the
    final layer to a multiple of 128 so output stores are dense `vst`.
    Returns (prepared_params, classes).
    """
    classes = params["w3"].shape[1]
    c_pad = _round_up(classes, 128)
    w3 = params["w3"].astype(compute_dtype)
    b3 = params["b3"].astype(jnp.float32)
    if c_pad != classes:
        w3 = jnp.pad(w3, ((0, 0), (0, c_pad - classes)))
        b3 = jnp.pad(b3, ((0, 0), (0, c_pad - classes)))
    prepped = {
        "w1": params["w1"].astype(compute_dtype),
        "b1": params["b1"].astype(jnp.float32),
        "w2": params["w2"].astype(compute_dtype),
        "b2": params["b2"].astype(jnp.float32),
        "w3": w3,
        "b3": b3,
    }
    return prepped, classes


@functools.partial(jax.jit, static_argnames=("classes", "tile_b", "out_dtype"))
def sccl_forward(embeddings, prepped, *, classes, tile_b=None, out_dtype=jnp.float32):
    """embeddings: [B, E] f32; prepped: output of prepare_params (weights [in,out])."""
    B, E = embeddings.shape
    C_pad = prepped["w3"].shape[1]
    compute_dtype = prepped["w1"].dtype

    # Batch tiling: aim for >=2 grid steps (both v7x TensorCores get work via
    # the "parallel" grid axis) while capping the tile at 512 rows, which keeps
    # per-step pipeline overhead amortized on v5e/v6e and VMEM use small.
    B_min = _round_up(B, 8)
    if tile_b is None:
        tile_b = min(512, max(8, _round_up(pl.cdiv(B_min, 2), 8)))
    else:
        tile_b = _round_up(tile_b, 8)
    B_pad = _round_up(B, tile_b)

    x = embeddings
    if B_pad != B:
        x = jnp.pad(x, ((0, B_pad - B), (0, 0)))

    # Constant weight/bias blocks: single-buffer them once they are big enough
    # that double-buffering actually costs VMEM (matters for large E, esp. on
    # v7x's 64 MiB VMEM).  At small E keep the default (2 buffers).
    weight_bytes = (2 * E * E + E * C_pad) * jnp.dtype(compute_dtype).itemsize
    single_buffer_weights = weight_bytes > (8 << 20)
    weight_bufs = 1 if single_buffer_weights else 2

    full = lambda i: (0, 0)  # weights/biases fully resident; block never changes

    def const_spec(shape):
        if single_buffer_weights:
            return pl.BlockSpec(shape, full, pipeline_mode=pl.Buffered(1))
        return pl.BlockSpec(shape, full)

    grid = (B_pad // tile_b,)

    out = pl.pallas_call(
        sccl_forward_kernel,
        out_shape=jax.ShapeDtypeStruct((B_pad, C_pad), out_dtype),
        grid_spec=pltpu.PrefetchScalarGridSpec(
            num_scalar_prefetch=0,
            grid=grid,
            in_specs=[
                pl.BlockSpec((tile_b, E), lambda i: (i, 0)),   # x tile (f32)
                const_spec((E, E)),                            # w1 (bf16)
                const_spec((1, E)),                            # b1 (f32)
                const_spec((E, E)),                            # w2 (bf16)
                const_spec((1, E)),                            # b2 (f32)
                const_spec((E, C_pad)),                        # w3 (bf16, lane-padded)
                const_spec((1, C_pad)),                        # b3 (f32, lane-padded)
            ],
            out_specs=pl.BlockSpec((tile_b, C_pad), lambda i: (i, 0)),
        ),
        compiler_params=pltpu.CompilerParams(
            dimension_semantics=("parallel",),
            vmem_limit_bytes=_vmem_limit_bytes(
                tile_b, E, C_pad, compute_dtype, out_dtype, weight_bufs
            ),
        ),
    )(x, prepped["w1"], prepped["b1"], prepped["w2"], prepped["b2"],
      prepped["w3"], prepped["b3"])

    # Strip batch / class padding (fuses into the jitted wrapper).
    return out[:B, :classes]


def init_params(key, emb_size, classes):
    """Deterministic synthetic weights (nn.Linear shapes, stored as [in, out])."""
    k1, k2, k3, k4, k5, k6 = jax.random.split(key, 6)
    scale = 0.02
    return {
        "w1": scale * jax.random.normal(k1, (emb_size, emb_size), jnp.float32),
        "b1": scale * jax.random.normal(k2, (1, emb_size), jnp.float32),
        "w2": scale * jax.random.normal(k3, (emb_size, emb_size), jnp.float32),
        "b2": scale * jax.random.normal(k4, (1, emb_size), jnp.float32),
        "w3": scale * jax.random.normal(k5, (emb_size, classes), jnp.float32),
        "b3": scale * jax.random.normal(k6, (1, classes), jnp.float32),
    }


def reference_forward(embeddings, params, compute_dtype=jnp.bfloat16):
    """Pure-JAX reference of SCCLBert.forward (eval-mode dropout), mirroring the
    kernel's bf16-weight / f32-accumulate numerics."""
    lo = lambda a: a.astype(compute_dtype)
    up = lambda a: a.astype(jnp.float32)
    hi = jax.lax.Precision.HIGHEST

    x = up(lo(embeddings))
    h1 = jnp.maximum(jnp.dot(x, up(lo(params["w1"])), precision=hi) + params["b1"], 0.0)
    h2 = jnp.maximum(jnp.dot(up(lo(h1)), up(lo(params["w2"])), precision=hi) + params["b2"], 0.0)
    return jnp.dot(up(lo(h2)), up(lo(params["w3"])), precision=hi) + params["b3"]


if __name__ == "__main__":
    # Small shapes consistent with the module: batch of pooled BERT embeddings.
    B = 16         # batch (>=16 exercises the multi-step "parallel" grid)
    E = 128        # bert hidden size (emb_size), kept small
    C = 500        # number of cluster "classes" for self.prob (module default)

    key = jax.random.PRNGKey(0)
    k_emb, k_params = jax.random.split(key)

    embeddings = jax.random.normal(k_emb, (B, E), jnp.float32)
    params = init_params(k_params, E, C)

    # One-time weight prep (cast + class-dim pad), reused across forward calls.
    prepped, classes = prepare_params(params)
    prepped = jax.tree_util.tree_map(jax.block_until_ready, prepped)

    out = sccl_forward(embeddings, prepped, classes=classes)
    out = jax.block_until_ready(out)

    ref = reference_forward(embeddings, params)
    assert out.shape == (B, C)
    assert jnp.allclose(out, ref, atol=1e-3, rtol=1e-3), "mismatch vs reference"

    print("KERNEL_OK")
</pallas_src>

<mosaic_0001>
module attributes {stable_mosaic.version = 11 : i64} {
  func.func @sccl_forward_kernel(%arg0: i32, %arg1: memref<8x128xf32, #tpu.memory_space<vmem>>, %arg2: memref<128x128xbf16, #tpu.memory_space<vmem>>, %arg3: memref<1x128xf32, #tpu.memory_space<vmem>>, %arg4: memref<128x128xbf16, #tpu.memory_space<vmem>>, %arg5: memref<1x128xf32, #tpu.memory_space<vmem>>, %arg6: memref<128x512xbf16, #tpu.memory_space<vmem>>, %arg7: memref<1x512xf32, #tpu.memory_space<vmem>>, %arg8: memref<8x512xf32, #tpu.memory_space<vmem>>) attributes {dimension_semantics = [#tpu.dimension_semantics<parallel>], iteration_bounds = array<i64: 2>, scalar_prefetch = 0 : i64, scratch_operands = 0 : i64, tpu.core_type = #tpu.core_type<tc>, window_params = [{transform_indices = @transform_0, window_bounds = array<i64: 8, 128>}, {pipeline_mode = #tpu.pipeline_mode<synchronous>, transform_indices = @transform_1, window_bounds = array<i64: 128, 128>}, {pipeline_mode = #tpu.pipeline_mode<synchronous>, transform_indices = @transform_2, window_bounds = array<i64: 1, 128>}, {pipeline_mode = #tpu.pipeline_mode<synchronous>, transform_indices = @transform_3, window_bounds = array<i64: 128, 128>}, {pipeline_mode = #tpu.pipeline_mode<synchronous>, transform_indices = @transform_4, window_bounds = array<i64: 1, 128>}, {pipeline_mode = #tpu.pipeline_mode<synchronous>, transform_indices = @transform_5, window_bounds = array<i64: 128, 512>}, {pipeline_mode = #tpu.pipeline_mode<synchronous>, transform_indices = @transform_6, window_bounds = array<i64: 1, 512>}, {transform_indices = @transform_7, window_bounds = array<i64: 8, 512>}]} {
    %c0 = arith.constant 0 : index
    %c0_0 = arith.constant 0 : index
    %0 = vector.load %arg1[%c0, %c0_0] : memref<8x128xf32, #tpu.memory_space<vmem>>, vector<8x128xf32>
    %1 = arith.truncf %0 : vector<8x128xf32> to vector<8x128xbf16>
    %c0_1 = arith.constant 0 : index
    %c0_2 = arith.constant 0 : index
    %2 = vector.load %arg2[%c0_1, %c0_2] : memref<128x128xbf16, #tpu.memory_space<vmem>>, vector<128x128xbf16>
    %cst = arith.constant dense<0.000000e+00> : vector<8x128xf32>
    %3 = tpu.matmul %1, %2, %cst {dimension_numbers = #tpu.dot_dimension_numbers<[1], [0], [0], [1], [0, 0, 1, 1], [], []>} : vector<8x128xbf16>, vector<128x128xbf16>, vector<8x128xf32> -> vector<8x128xf32>
    %c0_3 = arith.constant 0 : index
    %c0_4 = arith.constant 0 : index
    %4 = vector.load %arg3[%c0_3, %c0_4] : memref<1x128xf32, #tpu.memory_space<vmem>>, vector<1x128xf32>
    %5 = vector.broadcast %4 : vector<1x128xf32> to vector<8x128xf32>
    %6 = arith.addf %3, %5 : vector<8x128xf32>
    %cst_5 = arith.constant 0.000000e+00 : f32
    %7 = vector.broadcast %cst_5 : f32 to vector<8x128xf32>
    %8 = arith.maximumf %6, %7 : vector<8x128xf32>
    %9 = arith.truncf %8 : vector<8x128xf32> to vector<8x128xbf16>
    %c0_6 = arith.constant 0 : index
    %c0_7 = arith.constant 0 : index
    %10 = vector.load %arg4[%c0_6, %c0_7] : memref<128x128xbf16, #tpu.memory_space<vmem>>, vector<128x128xbf16>
    %cst_8 = arith.constant dense<0.000000e+00> : vector<8x128xf32>
    %11 = tpu.matmul %9, %10, %cst_8 {dimension_numbers = #tpu.dot_dimension_numbers<[1], [0], [0], [1], [0, 0, 1, 1], [], []>} : vector<8x128xbf16>, vector<128x128xbf16>, vector<8x128xf32> -> vector<8x128xf32>
    %c0_9 = arith.constant 0 : index
    %c0_10 = arith.constant 0 : index
    %12 = vector.load %arg5[%c0_9, %c0_10] : memref<1x128xf32, #tpu.memory_space<vmem>>, vector<1x128xf32>
    %13 = vector.broadcast %12 : vector<1x128xf32> to vector<8x128xf32>
    %14 = arith.addf %11, %13 : vector<8x128xf32>
    %cst_11 = arith.constant 0.000000e+00 : f32
    %15 = vector.broadcast %cst_11 : f32 to vector<8x128xf32>
    %16 = arith.maximumf %14, %15 : vector<8x128xf32>
    %17 = arith.truncf %16 : vector<8x128xf32> to vector<8x128xbf16>
    %c0_12 = arith.constant 0 : index
    %c0_13 = arith.constant 0 : index
    %18 = vector.load %arg6[%c0_12, %c0_13] : memref<128x512xbf16, #tpu.memory_space<vmem>>, vector<128x512xbf16>
    %cst_14 = arith.constant dense<0.000000e+00> : vector<8x512xf32>
    %19 = tpu.matmul %17, %18, %cst_14 {dimension_numbers = #tpu.dot_dimension_numbers<[1], [0], [0], [1], [0, 0, 1, 1], [], []>} : vector<8x128xbf16>, vector<128x512xbf16>, vector<8x512xf32> -> vector<8x512xf32>
    %c0_15 = arith.constant 0 : index
    %c0_16 = arith.constant 0 : index
    %20 = vector.load %arg7[%c0_15, %c0_16] : memref<1x512xf32, #tpu.memory_space<vmem>>, vector<1x512xf32>
    %21 = vector.broadcast %20 : vector<1x512xf32> to vector<8x512xf32>
    %22 = arith.addf %19, %21 : vector<8x512xf32>
    %c0_17 = arith.constant 0 : index
    %c0_18 = arith.constant 0 : index
    %23 = vector.load %arg8[%c0_17, %c0_18] : memref<8x512xf32, #tpu.memory_space<vmem>>, vector<8x512xf32>
    tpu.vector_store %arg8[%c0_17, %c0_18], %22 {strides = array<i32>} : memref<8x512xf32, #tpu.memory_space<vmem>>, vector<8x512xf32>,
    return
  }
  func.func @transform_0(%arg0: i32) -> (i32, i32) {
    %c0_i32 = arith.constant 0 : i32
    %c0_i32_0 = arith.constant 0 : i32
    return %arg0, %c0_i32 : i32, i32
  }
  func.func @transform_1(%arg0: i32) -> (i32, i32) {
    %c0_i32 = arith.constant 0 : i32
    %c0_i32_0 = arith.constant 0 : i32
    %c0_i32_1 = arith.constant 0 : i32
    return %c0_i32, %c0_i32_0 : i32, i32
  }
  func.func @transform_2(%arg0: i32) -> (i32, i32) {
    %c0_i32 = arith.constant 0 : i32
    %c0_i32_0 = arith.constant 0 : i32
    %c0_i32_1 = arith.constant 0 : i32
    return %c0_i32, %c0_i32_0 : i32, i32
  }
  func.func @transform_3(%arg0: i32) -> (i32, i32) {
    %c0_i32 = arith.constant 0 : i32
    %c0_i32_0 = arith.constant 0 : i32
    %c0_i32_1 = arith.constant 0 : i32
    return %c0_i32, %c0_i32_0 : i32, i32
  }
  func.func @transform_4(%arg0: i32) -> (i32, i32) {
    %c0_i32 = arith.constant 0 : i32
    %c0_i32_0 = arith.constant 0 : i32
    %c0_i32_1 = arith.constant 0 : i32
    return %c0_i32, %c0_i32_0 : i32, i32
  }
  func.func @transform_5(%arg0: i32) -> (i32, i32) {
    %c0_i32 = arith.constant 0 : i32
    %c0_i32_0 = arith.constant 0 : i32
    %c0_i32_1 = arith.constant 0 : i32
    return %c0_i32, %c0_i32_0 : i32, i32
  }
  func.func @transform_6(%arg0: i32) -> (i32, i32) {
    %c0_i32 = arith.constant 0 : i32
    %c0_i32_0 = arith.constant 0 : i32
    %c0_i32_1 = arith.constant 0 : i32
    return %c0_i32, %c0_i32_0 : i32, i32
  }
  func.func @transform_7(%arg0: i32) -> (i32, i32) {
    %c0_i32 = arith.constant 0 : i32
    %c0_i32_0 = arith.constant 0 : i32
    return %arg0, %c0_i32 : i32, i32
  }
}

</mosaic_0001>

<bundles_post_ra>
// kernel: sccl_forward.1
= control target key start
LH: loop header
LB: loop body
LE: loop exit
PB: predicated region body
PF: predicated region fallthrough
CT: control target
= control target key end

     0   :  { %12 = vsyncpa [#allocation3], 0  ;;  %s1766_s0 = inlined_call_operand.hbm [shape: f32[16,128], index: 0, kind: input, shape index: {}]   ;;  %s1767_s1 = inlined_call_operand.hbm [shape: bf16[128,128], index: 1, kind: input, shape index: {}]   ;;  %s1768_s2 = inlined_call_operand.vmem [shape: f32[1,128], index: 2, kind: input, shape index: {}]   ;;  %s1769_s3 = inlined_call_operand.hbm [shape: bf16[128,128], index: 3, kind: input, shape index: {}]   ;;  %s1770_s4 = inlined_call_operand.vmem [shape: f32[1,128], index: 4, kind: input, shape index: {}]   ;;  %s1771_s5 = inlined_call_operand.hbm [shape: bf16[128,512], index: 5, kind: input, shape index: {}]   ;;  %s1772_s6 = inlined_call_operand.vmem [shape: f32[1,512], index: 6, kind: input, shape index: {}]   ;;  %s1773_s7 = inlined_call_operand.hbm [shape: f32[16,512], index: 7, kind: output, shape index: {}]  }
   0x1   :  { %14 = vsyncpa [#allocation3 + $0x1], 0 }
   0x2   :  { %15 = vsyncpa [#allocation6], 0 }
   0x3   :  { %16 = vsyncpa [#allocation9], 0 }
   0x4   :  { %17 = vsyncpa [#allocation4], 0 }
   0x5   :  { %19 = vsyncpa [#allocation4 + $0x1], 0  ;;  %s1499_s24 = smov 0   ;;  %s1501_s25 = smov 0  }
   0x6   :  { %s1503_s26 = smov 0   ;;  %s1505_s27 = smov 0  }
   0x7 LB: > { %s1520_s28 = sadd.s32 4294967295, %s1445_s27   ;;  %s981_s29 = sadd.s32 4294967294, %s1445_s27   ;;  %s1445_s27 = sphi %s1505_s27, %s1799_s27   ;;  %s1441_s26 = sphi %s1503_s26, %s1798_s26   ;;  %s1437_s25 = sphi %s1501_s25, %s1797_s25   ;;  %s1433_s24 = sphi %s1499_s24, %s1796_s24  }
   0x8   : > { %p45_p0 = scmp.ne.s32.totalorder %s1437_s25, %s1433_s24  ;;  %p1774_p1 = scmp.eq.s32.totalorder %s1520_s28, 0 }
   0x9   : > { %p201_p3 = scmp.eq.s32.totalorder %s981_s29, 1  ;;  %p982_p5 = scmp.ge.s32.totalorder %s1445_s27, 1 }
   0xa   : > { %p1529_p4 = por %p1774_p1, %p45_p0  ;;  %p208_p7 = scmp.lt.s32.totalorder %s1445_s27, 3 }
   0xb   : > { %p1534_p6 = por %p201_p3, %p45_p0  ;;  %s1447_s10 = smov [#allocation5]  }
   0xc   : > { %s1778_s30 = scalar_select %p1529_p4, 1, 0 }
   0xd   : > { %s1779_s8 = scalar_select %p1534_p6, 1, 0 }
   0xe   : > { %p1539_p8 = pnand %p982_p5, %p208_p7  ;;  %s220_s11 = sshll.u32 %s1447_s10, 4  ;;  %s1543_s11 = int_to_ptr.vmem [resolvable:$true] %s220_s11 }
   0xf   : > { %1780 = sst [smem:[#allocation15_spill]] %s1779_s8  ;;  %s1448_s13 = smov [#allocation7]  }
  0x10   : > { %s1781_s9 = scalar_select %p1539_p8, 1, 0 }
  0x11   : > { %p1125_p9 = pneg %p1539_p8  ;;  %s236_s14 = sshll.u32 %s1448_s13, 4  ;;  %s1554_s14 = int_to_ptr.vmem [resolvable:$true] %s236_s14 }
  0x12   : > { %s1449_s15 = smov [#allocation8]   ;;  %s1257_s19 = scalar_lea.hbm %s1767_s1, 1024 }
  0x13   : > { %p1550_p11 = pnand %p1125_p9, %p1774_p1  ;;  %s1556_s16 = sshll.u32 %s1449_s15, 4  ;;  %s253_s16 = int_to_ptr.vmem [resolvable:$true] %s1556_s16 }
  0x14   : > { %p1258_p12 = scmp.ne.s32.totalorder %s1767_s1, %s1257_s19  ;;  %p1264_p5 = scmp.lt.u32.totalorder %s1257_s19, %s1767_s1 }
  0x15   : > { %p1566_p13 = pneg %p1550_p11 }
  0x17   : > { %p1260_p0 = pnand %p1566_p13, %p1258_p12 }
  0x19   : > { %p1261_p3 = pneg %p1260_p0 }
  0x1b   : > { %p1266_p7 = pnand %p1264_p5, %p1261_p3 }
  0x1d   : > { %1269 = shalt.err (!%p1266_p7)
}
  0x1e   : > { %s1270_s10 = scalar_lea.vmem %s1543_s11, 1024  ;;  %p1278_p2 = scmp.lt.s32.totalorder %s1543_s11, %s1543_s11 }
  0x1f   : > { %p1271_p9 = scmp.ne.s32.totalorder %s1543_s11, %s1270_s10  ;;  %p1279_p6 = scmp.lt.s32.totalorder %s1270_s10, %s1270_s10 }
  0x21   : > { %p1273_p10 = pnand %p1271_p9, %p1566_p13  ;;  %p1280_p12 = por %p1279_p6, %p1278_p2 }
  0x23   : > { %p1274_p1 = pneg %p1273_p10 }
  0x25   : > { %p1281_p0 = pnand %p1280_p12, %p1274_p1 }
  0x27   : > { %1284 = shalt.err (!%p1281_p0)
}
  0x28   : > { %s1450_s13 = smov 64   ;;  %s1451_s15 = smov 4  }
  0x29   : > { %1128 = dma.hbm_to_vmem [thread:$0]  (!%p1550_p11), %s1767_s1, 1024, %s1543_s11, [#allocation6], %s1450_s13, %s1450_s13, %s1451_s15  }
  0x2a   : > { %s1285_s21 = scalar_lea.hbm %s1769_s3, 1024 }
  0x2b   : > { %p1286_p2 = scmp.ne.s32.totalorder %s1769_s3, %s1285_s21  ;;  %p1292_p10 = scmp.lt.u32.totalorder %s1285_s21, %s1769_s3 }
  0x2d   : > { %p1288_p1 = pnand %p1286_p2, %p1566_p13 }
  0x2f   : > { %p1289_p6 = pneg %p1288_p1 }
  0x31   : > { %p1294_p3 = pnand %p1292_p10, %p1289_p6 }
  0x33   : > { %1297 = shalt.err (!%p1294_p3)
}
  0x34   : > { %s1298_s11 = scalar_lea.vmem %s1554_s14, 1024  ;;  %p1306_p12 = scmp.lt.s32.totalorder %s1554_s14, %s1554_s14 }
  0x35   : > { %p1299_p5 = scmp.ne.s32.totalorder %s1554_s14, %s1298_s11  ;;  %p1307_p0 = scmp.lt.s32.totalorder %s1298_s11, %s1298_s11 }
  0x37   : > { %p1301_p7 = pnand %p1299_p5, %p1566_p13  ;;  %p1308_p2 = por %p1307_p0, %p1306_p12 }
  0x39   : > { %p1302_p9 = pneg %p1301_p7 }
  0x3b   : > { %p1309_p1 = pnand %p1308_p2, %p1302_p9 }
  0x3d   : > { %1312 = shalt.err (!%p1309_p1)
}
  0x3e   : > { %1131 = dma.hbm_to_vmem [thread:$0]  (!%p1550_p11), %s1769_s3, 1024, %s1554_s14, [#allocation6], %s1450_s13, %s1450_s13, %s1451_s15  }
  0x3f   : > { %s1313_s20 = scalar_lea.hbm %s1771_s5, 4096 }
  0x40   : > { %p1314_p6 = scmp.ne.s32.totalorder %s1771_s5, %s1313_s20  ;;  %p1320_p5 = scmp.lt.u32.totalorder %s1313_s20, %s1771_s5 }
  0x42   : > { %p1316_p10 = pnand %p1314_p6, %p1566_p13 }
  0x44   : > { %p1317_p3 = pneg %p1316_p10 }
  0x46   : > { %p1322_p7 = pnand %p1320_p5, %p1317_p3 }
  0x48   : > { %1325 = shalt.err (!%p1322_p7)
}
  0x49   : > { %s1326_s11 = scalar_lea.vmem %s253_s16, 4096  ;;  %p1334_p2 = scmp.lt.s32.totalorder %s253_s16, %s253_s16 }
  0x4a   : > { %p1327_p9 = scmp.ne.s32.totalorder %s253_s16, %s1326_s11  ;;  %p1335_p1 = scmp.lt.s32.totalorder %s1326_s11, %s1326_s11 }
  0x4c   : > { %p1329_p12 = pnand %p1327_p9, %p1566_p13  ;;  %p1336_p4 = por %p1335_p1, %p1334_p2 }
  0x4e   : > { %p1330_p0 = pneg %p1329_p12 }
  0x50   : > { %p1337_p8 = pnand %p1336_p4, %p1330_p0 }
  0x52   : > { %1340 = shalt.err (!%p1337_p8)
}
  0x53   : > { %s1452_s14 = smov 256   ;;  %s1453_s22 = smov 16  }
  0x54   : > { %1134 = dma.hbm_to_vmem [thread:$0]  (!%p1550_p11), %s1771_s5, 4096, %s253_s16, [#allocation9], %s1452_s14, %s1452_s14, %s1453_s22  }
  0x55   : > { %s1630_s8 = sadd.s32 1, %s1445_s27   ;;  %s32_s18 = sadd.s32 1, %s1441_s26 }
  0x56   : > { %s29_s17 = ssub.s32 %s1445_s27, %s1630_s8  ;;  %p39_p8 = scmp.ne.s32.totalorder %s1441_s26, %s1437_s25 }
  0x57   : > { %p30_p4 = scmp.eq.s32.totalorder %s29_s17, 0  ;;  %p40_p13 = scmp.eq.s32.totalorder %s1445_s27, 0 }
  0x58   : > { %p1146_p6 = scmp.lt.s32.totalorder %s1445_s27, 2  ;;  %p1784_p3 = scmp.eq.s32.totalorder %s1520_s28, 1 }
  0x59   : > { %s1640_s19 = scalar_select %p30_p4, %s1441_s26, %s32_s18  }
  0x5a   : > { %p41_p10 = por %p40_p13, %p39_p8  ;;  %p1644_p5 = por %p1784_p3, %p39_p8 }
  0x5b   : > { %s269_s12 = sand.u32 1, %s1441_s26   ;;  %s988_s21 = sshll.u32 %s1445_s27, 7 }
  0x5c   : > { %s987_s16 = sshll.u32 %s269_s12, 3  ;;  %s1653_s10 = scalar_lea.hbm %s1766_s0, %s988_s21 }
  0x5d   : > { %s273_s11 = scalar_lea.vmem [#allocation2], %s987_s16  ;;  %p1655_p11 = pnand %p1146_p6, %p41_p10 }
  0x5e   : > { %s280_s14 = sshll.u32 %s273_s11, 4  ;;  %s270_s13 = scalar_lea.sflag [#allocation3], %s269_s12  ;;  %s1659_s14 = int_to_ptr.vmem [resolvable:$true] %s280_s14 }
  0x5f   : > { %s1341_s15 = scalar_lea.hbm %s1653_s10, 128  ;;  %p1343_p9 = pneg %p1655_p11 }
  0x60   : > { %p1342_p7 = scmp.ne.s32.totalorder %s1653_s10, %s1341_s15  ;;  %s1346_s21 = scalar_lea.hbm %s1766_s0, 256 }
  0x61   : > { %p1347_p2 = scmp.lt.u32.totalorder %s1653_s10, %s1766_s0  ;;  %p1348_p1 = scmp.lt.u32.totalorder %s1346_s21, %s1341_s15 }
  0x62   : > { %p1344_p12 = pnand %p1343_p9, %p1342_p7  ;;  %p1350_p8 = scmp.lt.u32.totalorder %s1341_s15, %s1653_s10 }
  0x63   : > { %p1349_p4 = por %p1348_p1, %p1347_p2 }
  0x64   : > { %p1345_p0 = pneg %p1344_p12 }
  0x65   : > { %p1351_p13 = por %p1350_p8, %p1349_p4 }
  0x67   : > { %p1352_p6 = pnand %p1351_p13, %p1345_p0 }
  0x69   : > { %1355 = shalt.err (!%p1352_p6)
}
  0x6a   : > { %s1356_s12 = scalar_lea.vmem %s1659_s14, 128  ;;  %s1454_s29 = smov [#allocation2]  }
  0x6b   : > { %p1357_p10 = scmp.ne.s32.totalorder %s1659_s14, %s1356_s12  ;;  %s1361_s11 = sshll.u32 %s1454_s29, 4  ;;  %s1362_s11 = int_to_ptr.vmem [resolvable:$false] %s1361_s11 }
  0x6c   : > { %s1363_s17 = scalar_lea.vmem %s1362_s11, 256  ;;  %p1364_p12 = scmp.lt.s32.totalorder %s1659_s14, %s1362_s11 }
  0x6d   : > { %p1359_p3 = pnand %p1357_p10, %p1343_p9  ;;  %p1365_p2 = scmp.lt.s32.totalorder %s1363_s17, %s1356_s12 }
  0x6f   : > { %p1360_p7 = pneg %p1359_p3  ;;  %p1366_p1 = por %p1365_p2, %p1364_p12 }
  0x71   : > { %p1367_p4 = pnand %p1366_p1, %p1360_p7 }
  0x73   : > { %1370 = shalt.err (!%p1367_p4)
}
  0x74   : > { %1138 = dma.hbm_to_vmem [thread:$0]  (!%p1655_p11), %s1653_s10, 128, %s1659_s14, %s270_s13  }
  0x75   : > { %p1787_p0 = scmp.ne.s32.totalorder %s1781_s9, 0 }
  0x76   : > { %s1689_s15 = sand.u32 (!%p1787_p0), 1, %s1437_s25   ;;  %p1788_p9 = scmp.ne.s32.totalorder (!%p1787_p0), %s1778_s30, 0 }
  0x77   : > { %289 = sbr.rel (%p1787_p0) target bundleno = 833 (0x341), region = 48  ;;  %s990_s18 = sshll.u32 (!%p1787_p0), %s1689_s15, 3 }
  0x78   : > { %s292_s21 = scalar_lea.sflag (!%p1787_p0), [#allocation3], %s1689_s15  ;;  %s1693_s16 = scalar_lea.vmem (!%p1787_p0), [#allocation2], %s990_s18 }
  0x7e   : > { %1416 = dma.done.wait (%p1788_p9), %s292_s21, 128  }
  0x7f   : > { %1418 = vsyncadd (%p1788_p9), %s292_s21, 4294967168  ;;  %p1789_p11 = scmp.eq.s32.totalorder %s1520_s28, 0 }
  0x81   : > { %1420 = dma.done.wait (%p1789_p11), [#allocation6], 2048   ;;  %p1790_p8 = pmov %p1789_p11 }
  0x83   : > { %1422 = vsyncadd (%p1790_p8), [#allocation6], 4294965248  ;;  %p1791_p13 = pmov %p1790_p8 }
  0x84   : > { %p1792_p6 = pmov %p1790_p8 }
  0x85   : > { %1424 = dma.done.wait (%p1791_p13), [#allocation9], 4096  }
  0x86   : > { %1426 = vsyncadd (%p1792_p6), [#allocation9], 4294963200  ;;  %v1455_v0 = vmov 0.0   ;;  %vm1456_vm0 = vmmov 0   ;;  %v1193_v1 = vld [vmem:[#allocation5] sm:$0xff]   ;;  %v1194_v2 = vld [vmem:[#allocation5 + $0x8] sm:$0xff]  }
  0x87   : > { %1069 = vmatprep.subr.bf16.mxu0 %v1455_v0  ;;  %1085 = vmatprep.mubr.msk.bf16.mxu0 %vm1456_vm0, %v1455_v0  ;;  %v1195_v3 = vld [vmem:[#allocation5 + $0x10] sm:$0xff]   ;;  %v1201_v4 = vld [vmem:[#allocation7] sm:$0xff]   ;;  %v1196_v5 = vld [vmem:[#allocation5 + $0x18] sm:$0xff]   ;;  %v1457_v59 = vmov 0   ;;  %s994_s22 = sshll.u32 %s1689_s15, 5  ;;  %s1050_s12 = sshll.u32 %s1520_s28, 9 }
  0x88   : > { %1089 = vmatprep.subr.bf16.mxu1 %v1455_v0  ;;  %1105 = vmatprep.mubr.msk.bf16.mxu1 %vm1456_vm0, %v1455_v0  ;;  %v1202_v6 = vld [vmem:[#allocation7 + $0x8] sm:$0xff]   ;;  %v1197_v7 = vld [vmem:[#allocation5 + $0x20] sm:$0xff]   ;;  %v1203_v8 = vld [vmem:[#allocation7 + $0x10] sm:$0xff]   ;;  %s337_s29 = scalar_lea.vmem [#allocation10], %s994_s22  ;;  %s1722_s21 = scalar_lea.hbm %s1773_s7, %s1050_s12 }
  0x89   : > { %1070 = vmatpush3.bf16.msra.mxu0 %v1193_v1  ;;  %1090 = vmatpush3.bf16.msra.mxu1 %v1201_v4  ;;  %v1198_v9 = vld [vmem:[#allocation5 + $0x28] sm:$0xff]   ;;  %v1204_v10 = vld [vmem:[#allocation7 + $0x18] sm:$0xff]   ;;  %v1199_v11 = vld [vmem:[#allocation5 + $0x30] sm:$0xff]   ;;  %v601_v4 = vlaneseq  ;;  %s882_s11 = sshll.u32 %s337_s29, 4  ;;  %s868_s28 = scalar_lea.sflag [#allocation4], %s1689_s15  ;;  %s1724_s11 = int_to_ptr.vmem [resolvable:$true] %s882_s11 }
  0x8a   : > { %1071 = vmatprep.subr.bf16.mxu0 %v1455_v0  ;;  %1091 = vmatprep.subr.bf16.mxu1 %v1455_v0  ;;  %v1205_v12 = vld [vmem:[#allocation7 + $0x20] sm:$0xff]   ;;  %v1200_v13 = vld [vmem:[#allocation5 + $0x38] sm:$0xff]   ;;  %v1206_v15 = vld [vmem:[#allocation7 + $0x28] sm:$0xff]   ;;  %s1458_s30 = smov [#allocation10]  }
  0x8b   : > { %v339_v14 = vld [vmem:[%s1693_s16] sm:$0xff]  ;;  %s1371_s16 = scalar_lea.vmem %s1724_s11, 512  ;;  %s1375_s9 = sshll.u32 %s1458_s30, 4  ;;  %s1376_s9 = int_to_ptr.vmem [resolvable:$false] %s1375_s9 }
  0x8c   : > { %v340_v16 = vpack.c.bf16 %v339_v14, %v339_v14  ;;  %v1207_v17 = vld [vmem:[#allocation7 + $0x30] sm:$0xff]   ;;  %v1208_v18 = vld [vmem:[#allocation7 + $0x38] sm:$0xff]   ;;  %p1372_p10 = scmp.ne.s32.totalorder %s1724_s11, %s1371_s16  ;;  %s1377_s10 = scalar_lea.vmem %s1376_s9, 1024 }
  0x8d   : > { %1072 = vmatpush3.bf16.msra.mxu0 %v1194_v2  ;;  %1092 = vmatpush3.bf16.msra.mxu1 %v1202_v6  ;;  %v1209_v19 = vld [vmem:[#allocation8] ss:$16 sps:$4 sm:$0xff]   ;;  %v1211_v20 = vld [vmem:[#allocation8 + $0x4] ss:$16 sps:$4 sm:$0xff]   ;;  %v1214_v21 = vld [vmem:[#allocation8 + $0xc] ss:$16 sps:$4 sm:$0xff]   ;;  %p1378_p12 = scmp.lt.s32.totalorder %s1724_s11, %s1376_s9  ;;  %p1379_p2 = scmp.lt.s32.totalorder %s1377_s10, %s1371_s16 }
  0x8e   : > { %1073 = vmatprep.subr.bf16.mxu0 %v1455_v0  ;;  %1093 = vmatprep.subr.bf16.mxu1 %v1455_v0  ;;  %v1217_v22 = vld [vmem:[#allocation8 + $0x24] ss:$16 sps:$4 sm:$0xff]   ;;  %v1215_v23 = vld [vmem:[#allocation8 + $0x20] ss:$16 sps:$4 sm:$0xff]   ;;  %v1212_v41 = vld [vmem:[#allocation8 + $0x8] ss:$16 sps:$4 sm:$0xff]   ;;  %p1373_p3 = pnand %p1372_p10, %p1644_p5 }
  0x8f   : > { %v1223_v24 = vld [vmem:[#allocation8 + $0x44] ss:$16 sps:$4 sm:$0xff]   ;;  %v1221_v25 = vld [vmem:[#allocation8 + $0x40] ss:$16 sps:$4 sm:$0xff]   ;;  %v1220_v43 = vld [vmem:[#allocation8 + $0x2c] ss:$16 sps:$4 sm:$0xff]   ;;  %p1380_p1 = por %p1379_p2, %p1378_p12 }
  0x90   : > { %v1229_v26 = vld [vmem:[#allocation8 + $0x64] ss:$16 sps:$4 sm:$0xff]   ;;  %v1227_v27 = vld [vmem:[#allocation8 + $0x60] ss:$16 sps:$4 sm:$0xff]   ;;  %v1218_v44 = vld [vmem:[#allocation8 + $0x28] ss:$16 sps:$4 sm:$0xff]   ;;  %p1374_p7 = pneg %p1373_p3 }
  0x91   : > { %1074 = vmatpush3.bf16.msra.mxu0 %v1195_v3  ;;  %1094 = vmatpush3.bf16.msra.mxu1 %v1203_v8  ;;  %v1235_v28 = vld [vmem:[#allocation8 + $0x84] ss:$16 sps:$4 sm:$0xff]   ;;  %v1233_v29 = vld [vmem:[#allocation8 + $0x80] ss:$16 sps:$4 sm:$0xff]   ;;  %v1226_v45 = vld [vmem:[#allocation8 + $0x4c] ss:$16 sps:$4 sm:$0xff]  }
  0x92   : > { %1075 = vmatprep.subr.bf16.mxu0 %v1455_v0  ;;  %1095 = vmatprep.subr.bf16.mxu1 %v1455_v0  ;;  %v1241_v30 = vld [vmem:[#allocation8 + $0xa4] ss:$16 sps:$4 sm:$0xff]   ;;  %v1239_v31 = vld [vmem:[#allocation8 + $0xa0] ss:$16 sps:$4 sm:$0xff]   ;;  %v1224_v46 = vld [vmem:[#allocation8 + $0x48] ss:$16 sps:$4 sm:$0xff]   ;;  %p1381_p4 = pnand %p1380_p1, %p1374_p7 }
  0x93   : > { %v1247_v32 = vld [vmem:[#allocation8 + $0xc4] ss:$16 sps:$4 sm:$0xff]   ;;  %v1245_v33 = vld [vmem:[#allocation8 + $0xc0] ss:$16 sps:$4 sm:$0xff]   ;;  %v1232_v47 = vld [vmem:[#allocation8 + $0x6c] ss:$16 sps:$4 sm:$0xff]  }
  0x94   : > { %v995_v34 = vld [vmem:[%s1768_s2] ss:$0 sm:$0xff]  ;;  %v1230_v48 = vld [vmem:[#allocation8 + $0x68] ss:$16 sps:$4 sm:$0xff]   ;;  %v1238_v49 = vld [vmem:[#allocation8 + $0x8c] ss:$16 sps:$4 sm:$0xff]  }
  0x95   : > { %1076 = vmatpush3.bf16.msra.mxu0 %v1196_v5  ;;  %1096 = vmatpush3.bf16.msra.mxu1 %v1204_v10  ;;  %v1236_v50 = vld [vmem:[#allocation8 + $0x88] ss:$16 sps:$4 sm:$0xff]   ;;  %v1244_v51 = vld [vmem:[#allocation8 + $0xac] ss:$16 sps:$4 sm:$0xff]   ;;  %v1253_v55 = vld [vmem:[#allocation8 + $0xe4] ss:$16 sps:$4 sm:$0xff]  }
  0x96   : > { %1077 = vmatprep.subr.bf16.mxu0 %v1455_v0  ;;  %1097 = vmatprep.subr.bf16.mxu1 %v1455_v0  ;;  %v1242_v52 = vld [vmem:[#allocation8 + $0xa8] ss:$16 sps:$4 sm:$0xff]   ;;  %v1250_v53 = vld [vmem:[#allocation8 + $0xcc] ss:$16 sps:$4 sm:$0xff]   ;;  %v1251_v57 = vld [vmem:[#allocation8 + $0xe0] ss:$16 sps:$4 sm:$0xff]  }
  0x97   : > { %v1248_v54 = vld [vmem:[#allocation8 + $0xc8] ss:$16 sps:$4 sm:$0xff]   ;;  %v1256_v56 = vld [vmem:[#allocation8 + $0xec] ss:$16 sps:$4 sm:$0xff]   ;;  %v1004_v60 = vld [vmem:[%s1770_s4] ss:$0 sm:$0xff] }
  0x98   : > { %v1254_v58 = vld [vmem:[#allocation8 + $0xe8] ss:$16 sps:$4 sm:$0xff]   ;;  %v602_v5 = vshrl.u32 %v601_v4, 7  ;;  %v599_v8 = vld [vmem:[%s1772_s6] sm:$0xf] }
  0x99   : > { %1078 = vmatpush3.bf16.msra.mxu0 %v1197_v7  ;;  %1098 = vmatpush3.bf16.msra.mxu1 %v1205_v12 }
  0x9a   : > { %1079 = vmatprep.subr.bf16.mxu0 %v1455_v0  ;;  %1099 = vmatprep.subr.bf16.mxu1 %v1455_v0  ;;  %v603_v6 = vsub.s32 0, %v602_v5  ;;  %v611_v7 = vsub.s32 2, %v602_v5  ;;  %v615_v10 = vsub.s32 3, %v602_v5 }
  0x9c   : > { %v612_v12 = vrot.slane %v599_v8, %v611_v7  ;;  %v616_v14 = vrot.slane %v599_v8, %v615_v10 }
  0x9d   : > { %1080 = vmatpush3.bf16.msra.mxu0 %v1198_v9  ;;  %1100 = vmatpush3.bf16.msra.mxu1 %v1206_v15  ;;  %v607_v9 = vsub.s32 1, %v602_v5 }
  0x9e   : > { %1081 = vmatprep.subr.bf16.mxu0 %v1455_v0  ;;  %1101 = vmatprep.subr.bf16.mxu1 %v1455_v0 }
  0xa1   : > { %1082 = vmatpush3.bf16.msra.mxu0 %v1199_v11  ;;  %1102 = vmatpush3.bf16.msra.mxu1 %v1207_v17  ;;  %v604_v11 = vrot.slane %v599_v8, %v603_v6 }
  0xa2   : > { %1083 = vmatprep.subr.bf16.mxu0 %v1455_v0  ;;  %1103 = vmatprep.subr.bf16.mxu1 %v1455_v0 }
  0xa5   : > { %1084 = vmatpush3.bf16.msra.mxu0 %v1200_v13  ;;  %1104 = vmatpush3.bf16.msra.mxu1 %v1208_v18  ;;  %v608_v13 = vrot.slane %v599_v8, %v607_v9 }
  0xa6   : > { %781 = vmatprep.subr.bf16.mxu0 %v1211_v20  ;;  %822 = vmatprep.subr.bf16.mxu1 %v1214_v21 }
  0xa8   : > { %1086 = vmatmul.mubr.bf16.vlgmr.msra.gmra.mrb[0].mxu0 %v340_v16 }
  0xa9   : > { %782 = vmatpush1.bf16.msra.mxu0 %v1209_v19  ;;  %813 = vmatprep.mubr.bf16.mxu0 %v1457_v59 }
  0xaa   : > { %783 = vmatprep.subr.bf16.mxu0 %v1217_v22 }
  0xad   : > { %784 = vmatpush1.bf16.msra.mxu0 %v1215_v23 }
  0xae   : > { %785 = vmatprep.subr.bf16.mxu0 %v1223_v24 }
  0xb1   : > { %786 = vmatpush1.bf16.msra.mxu0 %v1221_v25 }
  0xb2   : > { %787 = vmatprep.subr.bf16.mxu0 %v1229_v26 }
  0xb5   : > { %788 = vmatpush1.bf16.msra.mxu0 %v1227_v27 }
  0xb6   : > { %789 = vmatprep.subr.bf16.mxu0 %v1235_v28 }
  0xb9   : > { %790 = vmatpush1.bf16.msra.mxu0 %v1233_v29 }
  0xba   : > { %791 = vmatprep.subr.bf16.mxu0 %v1241_v30 }
  0xbd   : > { %792 = vmatpush1.bf16.msra.mxu0 %v1239_v31 }
  0xbe   : > { %793 = vmatprep.subr.bf16.mxu0 %v1247_v32 }
  0xc1   : > { %794 = vmatpush1.bf16.msra.mxu0 %v1245_v33 }
  0xc2   : > { %795 = vmatprep.subr.bf16.mxu0 %v1253_v55 }
  0xc5   : > { %796 = vmatpush1.bf16.msra.mxu0 %v1251_v57 }
 0x17b   : > { %v446_v35 = vpop.f32.mrb[0].mxu0 }
 0x17c   : > { %v447_v36 = vadd.f32 %v995_v34, %v446_v35  ;;  %v1087_v37 = vpop.f32.mrb[1].mxu0 }
 0x17d   : > { %v449_v38 = vpop.f32.mrb[2].mxu0 }
 0x17e   : > { %v452_v39 = vmax.f32 %v447_v36, 0.0  ;;  %v1088_v40 = vpop.f32.mrb[3].mxu0 }
 0x180   : > { %v453_v42 = vpack.c.bf16 %v452_v39, %v452_v39 }
 0x182   : > { %1106 = vmatmul.mubr.bf16.vlgmr.msra.gmra.mrb[0].mxu1 %v453_v42 }
 0x183   : > { %823 = vmatpush1.bf16.msra.mxu1 %v1212_v41  ;;  %854 = vmatprep.mubr.bf16.mxu1 %v1457_v59 }
 0x184   : > { %824 = vmatprep.subr.bf16.mxu1 %v1220_v43 }
 0x187   : > { %825 = vmatpush1.bf16.msra.mxu1 %v1218_v44 }
 0x188   : > { %826 = vmatprep.subr.bf16.mxu1 %v1226_v45 }
 0x18b   : > { %827 = vmatpush1.bf16.msra.mxu1 %v1224_v46 }
 0x18c   : > { %828 = vmatprep.subr.bf16.mxu1 %v1232_v47 }
 0x18f   : > { %829 = vmatpush1.bf16.msra.mxu1 %v1230_v48 }
 0x190   : > { %830 = vmatprep.subr.bf16.mxu1 %v1238_v49 }
 0x193   : > { %831 = vmatpush1.bf16.msra.mxu1 %v1236_v50 }
 0x194   : > { %832 = vmatprep.subr.bf16.mxu1 %v1244_v51 }
 0x197   : > { %833 = vmatpush1.bf16.msra.mxu1 %v1242_v52 }
 0x198   : > { %834 = vmatprep.subr.bf16.mxu1 %v1250_v53 }
 0x19b   : > { %835 = vmatpush1.bf16.msra.mxu1 %v1248_v54 }
 0x19c   : > { %836 = vmatprep.subr.bf16.mxu1 %v1256_v56 }
 0x19f   : > { %837 = vmatpush1.bf16.msra.mxu1 %v1254_v58 }
 0x255   : > { %v559_v61 = vpop.f32.mrb[0].mxu1 }
 0x256   : > { %v560_v62 = vadd.f32 %v1004_v60, %v559_v61  ;;  %v1107_v63 = vpop.f32.mrb[1].mxu1 }
 0x257   : > { %v562_v0 = vpop.f32.mrb[2].mxu1 }
 0x258   : > { %v565_v1 = vmax.f32 %v560_v62, 0.0  ;;  %v1108_v2 = vpop.f32.mrb[3].mxu1 }
 0x25a   : > { %v566_v3 = vpack.c.bf16 %v565_v1, %v565_v1 }
 0x25c   : > { %814 = vmatmul.mubr.bf16.vlgmr.msra.gmra.mrb[4].mxu0 %v566_v3  ;;  %855 = vmatmul.mubr.bf16.vlgmr.msra.gmra.mrb[4].mxu1 %v566_v3 }
 0x32f   : > { %v815_v15 = vpop.f32.mrb[4].mxu0  ;;  %v856_v16 = vpop.f32.mrb[4].mxu1 }
 0x330   : > { %v816_v17 = vadd.f32 %v815_v15, %v604_v11  ;;  %v857_v18 = vadd.f32 %v856_v16, %v612_v12  ;;  %v817_v19 = vpop.f32.mrb[5].mxu0  ;;  %v858_v20 = vpop.f32.mrb[5].mxu1 }
 0x331   : > { %v818_v21 = vadd.f32 %v817_v19, %v608_v13  ;;  %v859_v22 = vadd.f32 %v858_v20, %v616_v14  ;;  %v819_v23 = vpop.f32.mrb[6].mxu0  ;;  %v860_v24 = vpop.f32.mrb[6].mxu1 }
 0x332   : > { %863 = vst [vmem:[%s337_s29] sm:$0xff] %v816_v17  ;;  %865 = vst [vmem:[%s337_s29 + $0x10] sm:$0xff] %v857_v18  ;;  %v820_v25 = vpop.f32.mrb[7].mxu0  ;;  %v861_v26 = vpop.f32.mrb[7].mxu1 }
 0x333   : > { %864 = vst [vmem:[%s337_s29 + $0x8] sm:$0xff] %v818_v21  ;;  %866 = vst [vmem:[%s337_s29 + $0x18] sm:$0xff] %v859_v22 }
 0x334   : > { %1384 = shalt.err (!%p1381_p4)
}
 0x335   : > { %s1385_s15 = scalar_lea.hbm %s1722_s21, 512  ;;  %s1389_s13 = scalar_lea.hbm %s1773_s7, 1024 }
 0x336   : > { %p1386_p0 = scmp.ne.s32.totalorder %s1722_s21, %s1385_s15  ;;  %p1390_p8 = scmp.lt.u32.totalorder %s1722_s21, %s1773_s7 }
 0x337   : > { %p1391_p13 = scmp.lt.u32.totalorder %s1389_s13, %s1385_s15  ;;  %p1393_p10 = scmp.lt.u32.totalorder %s1385_s15, %s1722_s21 }
 0x338   : > { %p1387_p9 = pnand %p1386_p0, %p1644_p5 }
 0x339   : > { %p1392_p6 = por %p1391_p13, %p1390_p8 }
 0x33a   : > { %p1388_p11 = pneg %p1387_p9 }
 0x33b   : > { %p1394_p3 = por %p1393_p10, %p1392_p6 }
 0x33d   : > { %p1395_p7 = pnand %p1394_p3, %p1388_p11 }
 0x33f   : > { %1398 = shalt.err (!%p1395_p7)
}
 0x340   : > { %1123 = dma.vmem_to_hbm [thread:$0]  (%p1644_p5), %s1724_s11, 512, %s1722_s21, %s868_s28  }
 0x341 PF: > { %s1793_s29 = sld [smem:[#allocation15_spill]]  ;;  %s894_s17 = sand.u32 1, %s1433_s24  }
 0x342   : > { %p1795_p2 = scmp.ge.s32.totalorder %s1445_s27, 2  ;;  %s895_s18 = scalar_lea.sflag [#allocation4], %s894_s17 }
 0x347   : > { %p1794_p12 = scmp.ne.s32.totalorder %s1793_s29, 0 }
 0x349   : > { %p1140_p1 = pnand %p1795_p2, %p1794_p12 }
 0x34b   : > { %1428 = dma.done.wait (!%p1140_p1), %s895_s18, 512  }
 0x34c   : > { %1430 = vsyncadd (!%p1140_p1), %s895_s18, 4294966784  ;;  %p22_p4 = scmp.ge.s32.totalorder %s1630_s8, 4   ;;  %s1796_s24 = smov %s1437_s25 }
 0x34d   : > { %s1797_s25 = smov %s1441_s26  ;;  %s1798_s26 = smov %s1640_s19 }
 0x34e   : > { %s1799_s27 = smov %s1630_s8  ;;  %24 = sbr.rel (!%p22_p4) target bundleno = 7 (0x7), region = 105 }
 0x355   :  { %900 = vsyncpa [#allocation3], 1 }
 0x356   :  { %902 = vsyncpa [#allocation3 + $0x1], 1 }
 0x357   :  { %903 = vsyncpa [#allocation6], 1 }
 0x358   :  { %904 = vsyncpa [#allocation9], 1 }
 0x359   :  { %905 = vsyncpa [#allocation4], 1 }
 0x35a   :  { %907 = vsyncpa [#allocation4 + $0x1], 1 }

</bundles_post_ra>
